<compile_context>
chip_gen: v7x
topology: tpu7x:2x2x1
jax: 0.10.0
libtpu: 0.0.40
codegen_flags: <defaults>
</compile_context>

<pallas_src>
import math
import functools

import jax
import jax.numpy as jnp
from jax import lax
from jax.experimental import pallas as pl
from jax.experimental.pallas import tpu as pltpu


def _largest_divisor(dim, cap, align=1):
    """Largest tile t <= cap with dim % t == 0 and t % align == 0.

    Falls back to the full extent (always a legal block) if dim <= cap or no
    aligned divisor exists.
    """
    if dim <= cap:
        return dim
    for t in range(cap, 0, -1):
        if dim % t == 0 and t % align == 0:
            return t
    return dim


def _vmem_limit(est_bytes):
    """Per-kernel VMEM budget: estimate + headroom, capped below v7x physical."""
    return int(min(48 * 1024 * 1024, est_bytes + (16 << 20)))


# ---------------------------------------------------------------------------
# Linear (x @ w + b) kernel  — used for c_attn and c_proj
# ---------------------------------------------------------------------------
def _linear_kernel(x_ref, w_ref, b_ref, o_ref, acc_ref):
    k = pl.program_id(2)

    @pl.when(k == 0)
    def _():
        acc_ref[...] = jnp.zeros(acc_ref.shape, acc_ref.dtype)

    # Operands stay in their native dtype; accumulation is always f32.
    acc_ref[...] += jnp.dot(x_ref[...], w_ref[...],
                            preferred_element_type=jnp.float32)

    @pl.when(k == pl.num_programs(2) - 1)
    def _():
        o_ref[...] = (acc_ref[...] + b_ref[...].astype(jnp.float32)
                      ).astype(o_ref.dtype)


def _linear(x, w, b):
    """x: (N, Cin); w: (Cin, Cout) (pre-transposed vs. torch); b: (1, Cout)."""
    N, Cin = x.shape
    Cout = w.shape[1]
    tn = _largest_divisor(N, 512, align=8)       # token tile
    tf = _largest_divisor(Cout, 1152, align=128)  # out-feature tile (2304->1152, 768->768)
    tk = _largest_divisor(Cin, 768, align=128)    # reduction tile  (768 -> single K step)
    grid = (N // tn, Cout // tf, Cin // tk)

    isz = jnp.dtype(x.dtype).itemsize
    est = 2 * (tn * tk + tk * tf + tn * tf) * isz + tn * tf * 4  # dbl-buffered io + acc

    return pl.pallas_call(
        _linear_kernel,
        out_shape=jax.ShapeDtypeStruct((N, Cout), x.dtype),
        grid_spec=pltpu.PrefetchScalarGridSpec(
            num_scalar_prefetch=0,
            grid=grid,
            in_specs=[
                pl.BlockSpec((tn, tk), lambda i, j, k: (i, k)),
                pl.BlockSpec((tk, tf), lambda i, j, k: (k, j)),
                pl.BlockSpec((1, tf), lambda i, j, k: (0, j)),
            ],
            out_specs=pl.BlockSpec((tn, tf), lambda i, j, k: (i, j)),
            scratch_shapes=[pltpu.VMEM((tn, tf), jnp.float32)],
        ),
        compiler_params=pltpu.CompilerParams(
            dimension_semantics=("parallel", "parallel", "arbitrary"),
            vmem_limit_bytes=_vmem_limit(est)),
    )(x, w, b)


# ---------------------------------------------------------------------------
# Causal flash-attention kernel
#   input : qkv (B, T, 3C)  [q | k | v, each head-major within its C block]
#   output: y   (B, T, C)   [heads already merged, feature-major]
#   grid  : (B, q_tiles); the whole (T, 3C) slab is VMEM-resident per batch,
#           heads are a static (unrolled) loop, kv blocks a fori_loop bounded
#           by the causal diagonal.
# ---------------------------------------------------------------------------
def _attn_kernel(qkv_ref, o_ref, *, n_head, head_dim, blk, scale):
    C = n_head * head_dim
    i = pl.program_id(1)
    q_start = pl.multiple_of(i * blk, blk)

    # Causal mask for the single diagonal block; built once, shared by all heads.
    row = lax.broadcasted_iota(jnp.int32, (blk, blk), 0)
    col = lax.broadcasted_iota(jnp.int32, (blk, blk), 1)
    diag_mask = row >= col

    def online_step(q_s, k_blk, v_blk, m, l, acc, mask=None):
        # NT matmul straight on the MXU (no explicit transpose of the K tile).
        s = lax.dot_general(q_s, k_blk, (((1,), (1,)), ((), ())),
                            preferred_element_type=jnp.float32)
        if mask is not None:
            s = jnp.where(mask, s, -jnp.inf)
        m_new = jnp.maximum(m, s.max(axis=-1, keepdims=True))
        alpha = jnp.exp(m - m_new)
        p = jnp.exp(s - m_new)
        l_new = alpha * l + p.sum(axis=-1, keepdims=True)
        acc_new = alpha * acc + jnp.dot(p.astype(v_blk.dtype), v_blk,
                                        preferred_element_type=jnp.float32)
        return m_new, l_new, acc_new

    for h in range(n_head):          # static unroll -> static lane slices
        q0 = h * head_dim
        k0 = C + h * head_dim
        v0 = 2 * C + h * head_dim

        # Fold the softmax scale into q once (blk*hd multiplies, not blk*blk).
        q_s = qkv_ref[0, pl.ds(q_start, blk), q0:q0 + head_dim] * scale

        def kv_body(j, carry):
            m, l, acc = carry
            k_start = pl.multiple_of(j * blk, blk)
            k_blk = qkv_ref[0, pl.ds(k_start, blk), k0:k0 + head_dim]
            v_blk = qkv_ref[0, pl.ds(k_start, blk), v0:v0 + head_dim]
            return online_step(q_s, k_blk, v_blk, m, l, acc)

        m0 = jnp.full((blk, 1), -jnp.inf, jnp.float32)
        l0 = jnp.zeros((blk, 1), jnp.float32)
        acc0 = jnp.zeros((blk, head_dim), jnp.float32)

        # Blocks strictly below the diagonal: no masking work at all.
        m, l, acc = lax.fori_loop(0, i, kv_body, (m0, l0, acc0))

        # Diagonal block (always processed, so l > 0 — no NaN path).
        k_blk = qkv_ref[0, pl.ds(q_start, blk), k0:k0 + head_dim]
        v_blk = qkv_ref[0, pl.ds(q_start, blk), v0:v0 + head_dim]
        m, l, acc = online_step(q_s, k_blk, v_blk, m, l, acc, mask=diag_mask)

        # Per-head store into the lane-dense (blk, C) output block.
        o_ref[0, :, q0:q0 + head_dim] = (
            acc * pl.reciprocal(l, approx=True)).astype(o_ref.dtype)


def _flash_attention(qkv, *, n_head, head_dim, B, T):
    C = n_head * head_dim
    blk = _largest_divisor(T, 128, align=8)   # q tile == kv tile; capped for vregs
    nq = T // blk
    kernel = functools.partial(_attn_kernel, n_head=n_head, head_dim=head_dim,
                               blk=blk, scale=1.0 / math.sqrt(head_dim))

    isz = jnp.dtype(qkv.dtype).itemsize
    est = 2 * (T * 3 * C) * isz + 2 * (blk * C) * isz   # resident qkv + output tiles

    return pl.pallas_call(
        kernel,
        out_shape=jax.ShapeDtypeStruct((B, T, C), qkv.dtype),
        grid_spec=pltpu.PrefetchScalarGridSpec(
            num_scalar_prefetch=0,
            grid=(B, nq),
            in_specs=[
                # Whole (T, 3C) slab resident per batch: DMA'd once per b,
                # reused by every q tile and every head (no KV re-streaming).
                pl.BlockSpec((1, T, 3 * C), lambda b, i: (b, 0, 0)),
            ],
            out_specs=pl.BlockSpec((1, blk, C), lambda b, i: (b, i, 0)),
        ),
        compiler_params=pltpu.CompilerParams(
            dimension_semantics=("parallel", "parallel"),
            vmem_limit_bytes=_vmem_limit(est)),
    )(qkv)


# ---------------------------------------------------------------------------
# Full module forward
# ---------------------------------------------------------------------------
@functools.partial(jax.jit, static_argnames=("n_head",))
def causal_self_attention(x, w_attn, b_attn, w_proj, b_proj, *, n_head):
    """x: (B, T, C). Weights pre-transposed to (in, out); biases (1, out)."""
    B, T, C = x.shape
    assert C % n_head == 0
    hd = C // n_head

    qkv = _linear(x.reshape(B * T, C), w_attn, b_attn)       # (B*T, 3C)
    qkv = qkv.reshape(B, T, 3 * C)                           # free reshape, no copies
    y = _flash_attention(qkv, n_head=n_head, head_dim=hd, B=B, T=T)  # (B, T, C)
    y = _linear(y.reshape(B * T, C), w_proj, b_proj)         # (B*T, C)
    return y.reshape(B, T, C)


# ---------------------------------------------------------------------------
# Pure-JAX reference (mirrors the PyTorch module exactly)
# ---------------------------------------------------------------------------
def reference_attention(x, w_attn, b_attn, w_proj, b_proj, n_head):
    B, T, C = x.shape
    hd = C // n_head
    qkv = x @ w_attn + b_attn
    q, k, v = jnp.split(qkv, 3, axis=-1)
    q = q.reshape(B, T, n_head, hd).transpose(0, 2, 1, 3)
    k = k.reshape(B, T, n_head, hd).transpose(0, 2, 1, 3)
    v = v.reshape(B, T, n_head, hd).transpose(0, 2, 1, 3)
    att = (q @ jnp.swapaxes(k, -1, -2)) * (1.0 / math.sqrt(hd))
    mask = jnp.tril(jnp.ones((T, T), dtype=bool))
    att = jnp.where(mask[None, None], att, -jnp.inf)
    att = jax.nn.softmax(att, axis=-1)
    y = att @ v
    y = y.transpose(0, 2, 1, 3).reshape(B, T, C)
    return y @ w_proj + b_proj


if __name__ == "__main__":
    # Small GPT-2-style config: batch=2, seq=8, n_embd=32, n_head=4
    batch, seq, n_embd, n_head = 2, 8, 32, 4

    key = jax.random.PRNGKey(0)
    k_x, k_wa, k_ba, k_wp, k_bp = jax.random.split(key, 5)

    x = jax.random.normal(k_x, (batch, seq, n_embd), dtype=jnp.float32)

    # nn.Linear weights are (out, in); we store them pre-transposed as (in, out).
    w_attn = jax.random.normal(k_wa, (n_embd, 3 * n_embd), dtype=jnp.float32) * 0.02
    b_attn = jax.random.normal(k_ba, (1, 3 * n_embd), dtype=jnp.float32) * 0.02
    w_proj = jax.random.normal(k_wp, (n_embd, n_embd), dtype=jnp.float32) * 0.02
    b_proj = jax.random.normal(k_bp, (1, n_embd), dtype=jnp.float32) * 0.02

    out = causal_self_attention(x, w_attn, b_attn, w_proj, b_proj, n_head=n_head)
    out = jax.block_until_ready(out)

    ref = reference_attention(x, w_attn, b_attn, w_proj, b_proj, n_head)
    assert out.shape == (batch, seq, n_embd)
    assert jnp.allclose(out, ref, atol=2e-3, rtol=2e-3), "mismatch vs reference"

    print("KERNEL_OK")
</pallas_src>

<mosaic_0001>
module attributes {stable_mosaic.version = 11 : i64} {
  func.func @_linear_kernel(%arg0: i32, %arg1: i32, %arg2: i32, %arg3: memref<16x32xf32, #tpu.memory_space<vmem>>, %arg4: memref<32x96xf32, #tpu.memory_space<vmem>>, %arg5: memref<1x96xf32, #tpu.memory_space<vmem>>, %arg6: memref<16x96xf32, #tpu.memory_space<vmem>>, %arg7: memref<16x96xf32, #tpu.memory_space<vmem>>) attributes {dimension_semantics = [#tpu.dimension_semantics<parallel>, #tpu.dimension_semantics<parallel>, #tpu.dimension_semantics<arbitrary>], iteration_bounds = array<i64: 1, 1, 1>, scalar_prefetch = 0 : i64, scratch_operands = 1 : i64, tpu.core_type = #tpu.core_type<tc>, window_params = [{transform_indices = @transform_0, window_bounds = array<i64: 16, 32>}, {transform_indices = @transform_1, window_bounds = array<i64: 32, 96>}, {transform_indices = @transform_2, window_bounds = array<i64: 1, 96>}, {transform_indices = @transform_3, window_bounds = array<i64: 16, 96>}]} {
    %c0_i32 = arith.constant 0 : i32
    %0 = arith.cmpi eq, %arg2, %c0_i32 : i32
    %1 = arith.extui %0 : i1 to i32
    %c0_i32_0 = arith.constant 0 : i32
    %2 = arith.cmpi ne, %1, %c0_i32_0 : i32
    scf.if %2 {
      %cst_10 = arith.constant 0.000000e+00 : f32
      %12 = vector.broadcast %cst_10 : f32 to vector<16x96xf32>
      %c0_11 = arith.constant 0 : index
      %c0_12 = arith.constant 0 : index
      %13 = vector.load %arg7[%c0_11, %c0_12] : memref<16x96xf32, #tpu.memory_space<vmem>>, vector<16x96xf32>
      tpu.vector_store %arg7[%c0_11, %c0_12], %12 {strides = array<i32>} : memref<16x96xf32, #tpu.memory_space<vmem>>, vector<16x96xf32>,
    } else {
    }
    %c0 = arith.constant 0 : index
    %c0_1 = arith.constant 0 : index
    %3 = vector.load %arg7[%c0, %c0_1] : memref<16x96xf32, #tpu.memory_space<vmem>>, vector<16x96xf32>
    %c0_2 = arith.constant 0 : index
    %c0_3 = arith.constant 0 : index
    %4 = vector.load %arg3[%c0_2, %c0_3] : memref<16x32xf32, #tpu.memory_space<vmem>>, vector<16x32xf32>
    %c0_4 = arith.constant 0 : index
    %c0_5 = arith.constant 0 : index
    %5 = vector.load %arg4[%c0_4, %c0_5] : memref<32x96xf32, #tpu.memory_space<vmem>>, vector<32x96xf32>
    %cst = arith.constant dense<0.000000e+00> : vector<16x96xf32>
    %6 = tpu.matmul %4, %5, %cst {dimension_numbers = #tpu.dot_dimension_numbers<[1], [0], [0], [1], [0, 0, 1, 1], [], []>} : vector<16x32xf32>, vector<32x96xf32>, vector<16x96xf32> -> vector<16x96xf32>
    %7 = arith.addf %3, %6 : vector<16x96xf32>
    %c0_6 = arith.constant 0 : index
    %c0_7 = arith.constant 0 : index
    %8 = vector.load %arg7[%c0_6, %c0_7] : memref<16x96xf32, #tpu.memory_space<vmem>>, vector<16x96xf32>
    tpu.vector_store %arg7[%c0_6, %c0_7], %7 {strides = array<i32>} : memref<16x96xf32, #tpu.memory_space<vmem>>, vector<16x96xf32>,
    %c0_i32_8 = arith.constant 0 : i32
    %9 = arith.cmpi eq, %arg2, %c0_i32_8 : i32
    %10 = arith.extui %9 : i1 to i32
    %c0_i32_9 = arith.constant 0 : i32
    %11 = arith.cmpi ne, %10, %c0_i32_9 : i32
    scf.if %11 {
      %c0_10 = arith.constant 0 : index
      %c0_11 = arith.constant 0 : index
      %12 = vector.load %arg7[%c0_10, %c0_11] : memref<16x96xf32, #tpu.memory_space<vmem>>, vector<16x96xf32>
      %c0_12 = arith.constant 0 : index
      %c0_13 = arith.constant 0 : index
      %13 = vector.load %arg5[%c0_12, %c0_13] : memref<1x96xf32, #tpu.memory_space<vmem>>, vector<1x96xf32>
      %14 = vector.broadcast %13 : vector<1x96xf32> to vector<16x96xf32>
      %15 = arith.addf %12, %14 : vector<16x96xf32>
      %c0_14 = arith.constant 0 : index
      %c0_15 = arith.constant 0 : index
      %16 = vector.load %arg6[%c0_14, %c0_15] : memref<16x96xf32, #tpu.memory_space<vmem>>, vector<16x96xf32>
      tpu.vector_store %arg6[%c0_14, %c0_15], %15 {strides = array<i32>} : memref<16x96xf32, #tpu.memory_space<vmem>>, vector<16x96xf32>,
    } else {
    }
    return
  }
  func.func @transform_0(%arg0: i32, %arg1: i32, %arg2: i32) -> (i32, i32) {
    %c0_i32 = arith.constant 0 : i32
    return %arg0, %arg2 : i32, i32
  }
  func.func @transform_1(%arg0: i32, %arg1: i32, %arg2: i32) -> (i32, i32) {
    %c0_i32 = arith.constant 0 : i32
    return %arg2, %arg1 : i32, i32
  }
  func.func @transform_2(%arg0: i32, %arg1: i32, %arg2: i32) -> (i32, i32) {
    %c0_i32 = arith.constant 0 : i32
    %c0_i32_0 = arith.constant 0 : i32
    return %c0_i32, %arg1 : i32, i32
  }
  func.func @transform_3(%arg0: i32, %arg1: i32, %arg2: i32) -> (i32, i32) {
    %c0_i32 = arith.constant 0 : i32
    return %arg0, %arg1 : i32, i32
  }
}

module attributes {stable_mosaic.version = 11 : i64} {
  func.func @_linear_kernel(%arg0: i32, %arg1: i32, %arg2: i32, %arg3: memref<16x32xf32, #tpu.memory_space<vmem>>, %arg4: memref<32x32xf32, #tpu.memory_space<vmem>>, %arg5: memref<1x32xf32, #tpu.memory_space<vmem>>, %arg6: memref<16x32xf32, #tpu.memory_space<vmem>>, %arg7: memref<16x32xf32, #tpu.memory_space<vmem>>) attributes {dimension_semantics = [#tpu.dimension_semantics<parallel>, #tpu.dimension_semantics<parallel>, #tpu.dimension_semantics<arbitrary>], iteration_bounds = array<i64: 1, 1, 1>, scalar_prefetch = 0 : i64, scratch_operands = 1 : i64, tpu.core_type = #tpu.core_type<tc>, window_params = [{transform_indices = @transform_0, window_bounds = array<i64: 16, 32>}, {transform_indices = @transform_1, window_bounds = array<i64: 32, 32>}, {transform_indices = @transform_2, window_bounds = array<i64: 1, 32>}, {transform_indices = @transform_3, window_bounds = array<i64: 16, 32>}]} {
    %c0_i32 = arith.constant 0 : i32
    %0 = arith.cmpi eq, %arg2, %c0_i32 : i32
    %1 = arith.extui %0 : i1 to i32
    %c0_i32_0 = arith.constant 0 : i32
    %2 = arith.cmpi ne, %1, %c0_i32_0 : i32
    scf.if %2 {
      %cst_10 = arith.constant 0.000000e+00 : f32
      %12 = vector.broadcast %cst_10 : f32 to vector<16x32xf32>
      %c0_11 = arith.constant 0 : index
      %c0_12 = arith.constant 0 : index
      %13 = vector.load %arg7[%c0_11, %c0_12] : memref<16x32xf32, #tpu.memory_space<vmem>>, vector<16x32xf32>
      tpu.vector_store %arg7[%c0_11, %c0_12], %12 {strides = array<i32>} : memref<16x32xf32, #tpu.memory_space<vmem>>, vector<16x32xf32>,
    } else {
    }
    %c0 = arith.constant 0 : index
    %c0_1 = arith.constant 0 : index
    %3 = vector.load %arg7[%c0, %c0_1] : memref<16x32xf32, #tpu.memory_space<vmem>>, vector<16x32xf32>
    %c0_2 = arith.constant 0 : index
    %c0_3 = arith.constant 0 : index
    %4 = vector.load %arg3[%c0_2, %c0_3] : memref<16x32xf32, #tpu.memory_space<vmem>>, vector<16x32xf32>
    %c0_4 = arith.constant 0 : index
    %c0_5 = arith.constant 0 : index
    %5 = vector.load %arg4[%c0_4, %c0_5] : memref<32x32xf32, #tpu.memory_space<vmem>>, vector<32x32xf32>
    %cst = arith.constant dense<0.000000e+00> : vector<16x32xf32>
    %6 = tpu.matmul %4, %5, %cst {dimension_numbers = #tpu.dot_dimension_numbers<[1], [0], [0], [1], [0, 0, 1, 1], [], []>} : vector<16x32xf32>, vector<32x32xf32>, vector<16x32xf32> -> vector<16x32xf32>
    %7 = arith.addf %3, %6 : vector<16x32xf32>
    %c0_6 = arith.constant 0 : index
    %c0_7 = arith.constant 0 : index
    %8 = vector.load %arg7[%c0_6, %c0_7] : memref<16x32xf32, #tpu.memory_space<vmem>>, vector<16x32xf32>
    tpu.vector_store %arg7[%c0_6, %c0_7], %7 {strides = array<i32>} : memref<16x32xf32, #tpu.memory_space<vmem>>, vector<16x32xf32>,
    %c0_i32_8 = arith.constant 0 : i32
    %9 = arith.cmpi eq, %arg2, %c0_i32_8 : i32
    %10 = arith.extui %9 : i1 to i32
    %c0_i32_9 = arith.constant 0 : i32
    %11 = arith.cmpi ne, %10, %c0_i32_9 : i32
    scf.if %11 {
      %c0_10 = arith.constant 0 : index
      %c0_11 = arith.constant 0 : index
      %12 = vector.load %arg7[%c0_10, %c0_11] : memref<16x32xf32, #tpu.memory_space<vmem>>, vector<16x32xf32>
      %c0_12 = arith.constant 0 : index
      %c0_13 = arith.constant 0 : index
      %13 = vector.load %arg5[%c0_12, %c0_13] : memref<1x32xf32, #tpu.memory_space<vmem>>, vector<1x32xf32>
      %14 = vector.broadcast %13 : vector<1x32xf32> to vector<16x32xf32>
      %15 = arith.addf %12, %14 : vector<16x32xf32>
      %c0_14 = arith.constant 0 : index
      %c0_15 = arith.constant 0 : index
      %16 = vector.load %arg6[%c0_14, %c0_15] : memref<16x32xf32, #tpu.memory_space<vmem>>, vector<16x32xf32>
      tpu.vector_store %arg6[%c0_14, %c0_15], %15 {strides = array<i32>} : memref<16x32xf32, #tpu.memory_space<vmem>>, vector<16x32xf32>,
    } else {
    }
    return
  }
  func.func @transform_0(%arg0: i32, %arg1: i32, %arg2: i32) -> (i32, i32) {
    %c0_i32 = arith.constant 0 : i32
    return %arg0, %arg2 : i32, i32
  }
  func.func @transform_1(%arg0: i32, %arg1: i32, %arg2: i32) -> (i32, i32) {
    %c0_i32 = arith.constant 0 : i32
    return %arg2, %arg1 : i32, i32
  }
  func.func @transform_2(%arg0: i32, %arg1: i32, %arg2: i32) -> (i32, i32) {
    %c0_i32 = arith.constant 0 : i32
    %c0_i32_0 = arith.constant 0 : i32
    return %c0_i32, %arg1 : i32, i32
  }
  func.func @transform_3(%arg0: i32, %arg1: i32, %arg2: i32) -> (i32, i32) {
    %c0_i32 = arith.constant 0 : i32
    return %arg0, %arg1 : i32, i32
  }
}

module attributes {stable_mosaic.version = 11 : i64} {
  func.func @_attn_kernel(%arg0: i32, %arg1: i32, %arg2: memref<1x8x96xf32, #tpu.memory_space<vmem>>, %arg3: memref<1x8x32xf32, #tpu.memory_space<vmem>>) attributes {dimension_semantics = [#tpu.dimension_semantics<parallel>, #tpu.dimension_semantics<parallel>], iteration_bounds = array<i64: 2, 1>, scalar_prefetch = 0 : i64, scratch_operands = 0 : i64, tpu.core_type = #tpu.core_type<tc>, window_params = [{transform_indices = @transform_0, window_bounds = array<i64: 1, 8, 96>}, {transform_indices = @transform_1, window_bounds = array<i64: 1, 8, 32>}]} {
    %c8_i32 = arith.constant 8 : i32
    %0 = arith.muli %arg1, %c8_i32 : i32
    %1 = tpu.assume_multiple %0, 8 : i32
    %2 = tpu.iota {dimensions = array<i32: 0>} : vector<8x8xi32>
    %3 = tpu.iota {dimensions = array<i32: 1>} : vector<8x8xi32>
    %4 = arith.cmpi sge, %2, %3 : vector<8x8xi32>
    %c0 = arith.constant 0 : index
    %5 = arith.index_cast %1 : i32 to index
    %c0_0 = arith.constant 0 : index
    %6 = vector.load %arg2[%c0, %5, %c0_0] : memref<1x8x96xf32, #tpu.memory_space<vmem>>, vector<1x8x8xf32>
    %7 = vector.shape_cast %6 : vector<1x8x8xf32> to vector<8x8xf32>
    %cst = arith.constant 0.353553385 : f32
    %8 = vector.broadcast %cst : f32 to vector<8x8xf32>
    %9 = arith.mulf %7, %8 : vector<8x8xf32>
    %cst_1 = arith.constant 0xFF800000 : f32
    %10 = vector.broadcast %cst_1 : f32 to vector<8x1xf32>
    %cst_2 = arith.constant 0.000000e+00 : f32
    %11 = vector.broadcast %cst_2 : f32 to vector<8x1xf32>
    %cst_3 = arith.constant 0.000000e+00 : f32
    %12 = vector.broadcast %cst_3 : f32 to vector<8x8xf32>
    %c0_i32 = arith.constant 0 : i32
    %13 = arith.subi %arg1, %c0_i32 : i32
    %14 = arith.addi %c0_i32, %13 : i32
    %c1_i32 = arith.constant 1 : i32
    %15:3 = scf.for %arg4 = %c0_i32 to %14 step %c1_i32 iter_args(%arg5 = %10, %arg6 = %11, %arg7 = %12) -> (vector<8x1xf32>, vector<8x1xf32>, vector<8x8xf32>)  : i32 {
      %c8_i32_65 = arith.constant 8 : i32
      %173 = arith.muli %arg4, %c8_i32_65 : i32
      %174 = tpu.assume_multiple %173, 8 : i32
      %c0_66 = arith.constant 0 : index
      %175 = arith.index_cast %174 : i32 to index
      %c32_67 = arith.constant 32 : index
      %176 = vector.load %arg2[%c0_66, %175, %c32_67] : memref<1x8x96xf32, #tpu.memory_space<vmem>>, vector<1x8x8xf32>
      %177 = vector.shape_cast %176 : vector<1x8x8xf32> to vector<8x8xf32>
      %c0_68 = arith.constant 0 : index
      %178 = arith.index_cast %174 : i32 to index
      %c64_69 = arith.constant 64 : index
      %179 = vector.load %arg2[%c0_68, %178, %c64_69] : memref<1x8x96xf32, #tpu.memory_space<vmem>>, vector<1x8x8xf32>
      %180 = vector.shape_cast %179 : vector<1x8x8xf32> to vector<8x8xf32>
      %cst_70 = arith.constant dense<0.000000e+00> : vector<8x8xf32>
      %181 = tpu.matmul %9, %177, %cst_70 {dimension_numbers = #tpu.dot_dimension_numbers<[1], [1], [0], [0], [0, 0, 1, 0], [], []>} : vector<8x8xf32>, vector<8x8xf32>, vector<8x8xf32> -> vector<8x8xf32>
      %cst_71 = arith.constant dense<0xFF800000> : vector<8xf32>
      %182 = vector.multi_reduction <maximumf>, %181, %cst_71 [1] : vector<8x8xf32> to vector<8xf32>
      %183 = vector.shape_cast %182 : vector<8xf32> to vector<8x1xf32>
      %184 = arith.maximumf %arg5, %183 : vector<8x1xf32>
      %185 = arith.subf %arg5, %184 : vector<8x1xf32>
      %186 = math.exp %185 : vector<8x1xf32>
      %187 = vector.broadcast %184 : vector<8x1xf32> to vector<8x8xf32>
      %188 = arith.subf %181, %187 : vector<8x8xf32>
      %189 = math.exp %188 : vector<8x8xf32>
      %190 = arith.mulf %186, %arg6 : vector<8x1xf32>
      %cst_72 = arith.constant dense<0.000000e+00> : vector<8xf32>
      %191 = vector.multi_reduction <add>, %189, %cst_72 [1] : vector<8x8xf32> to vector<8xf32>
      %192 = vector.shape_cast %191 : vector<8xf32> to vector<8x1xf32>
      %193 = arith.addf %190, %192 : vector<8x1xf32>
      %194 = vector.broadcast %186 : vector<8x1xf32> to vector<8x8xf32>
      %195 = arith.mulf %194, %arg7 : vector<8x8xf32>
      %cst_73 = arith.constant dense<0.000000e+00> : vector<8x8xf32>
      %196 = tpu.matmul %189, %180, %cst_73 {dimension_numbers = #tpu.dot_dimension_numbers<[1], [0], [0], [1], [0, 0, 1, 1], [], []>} : vector<8x8xf32>, vector<8x8xf32>, vector<8x8xf32> -> vector<8x8xf32>
      %197 = arith.addf %195, %196 : vector<8x8xf32>
      scf.yield %184, %193, %197 : vector<8x1xf32>, vector<8x1xf32>, vector<8x8xf32>
    }
    %c0_4 = arith.constant 0 : index
    %16 = arith.index_cast %1 : i32 to index
    %c32 = arith.constant 32 : index
    %17 = vector.load %arg2[%c0_4, %16, %c32] : memref<1x8x96xf32, #tpu.memory_space<vmem>>, vector<1x8x8xf32>
    %18 = vector.shape_cast %17 : vector<1x8x8xf32> to vector<8x8xf32>
    %c0_5 = arith.constant 0 : index
    %19 = arith.index_cast %1 : i32 to index
    %c64 = arith.constant 64 : index
    %20 = vector.load %arg2[%c0_5, %19, %c64] : memref<1x8x96xf32, #tpu.memory_space<vmem>>, vector<1x8x8xf32>
    %21 = vector.shape_cast %20 : vector<1x8x8xf32> to vector<8x8xf32>
    %cst_6 = arith.constant dense<0.000000e+00> : vector<8x8xf32>
    %22 = tpu.matmul %9, %18, %cst_6 {dimension_numbers = #tpu.dot_dimension_numbers<[1], [1], [0], [0], [0, 0, 1, 0], [], []>} : vector<8x8xf32>, vector<8x8xf32>, vector<8x8xf32> -> vector<8x8xf32>
    %cst_7 = arith.constant 0xFF800000 : f32
    %23 = vector.broadcast %cst_7 : f32 to vector<8x8xf32>
    %24 = arith.select %4, %22, %23 : vector<8x8xi1>, vector<8x8xf32>
    %cst_8 = arith.constant dense<0xFF800000> : vector<8xf32>
    %25 = vector.multi_reduction <maximumf>, %24, %cst_8 [1] : vector<8x8xf32> to vector<8xf32>
    %26 = vector.shape_cast %25 : vector<8xf32> to vector<8x1xf32>
    %27 = arith.maximumf %15#0, %26 : vector<8x1xf32>
    %28 = arith.subf %15#0, %27 : vector<8x1xf32>
    %29 = math.exp %28 : vector<8x1xf32>
    %30 = vector.broadcast %27 : vector<8x1xf32> to vector<8x8xf32>
    %31 = arith.subf %24, %30 : vector<8x8xf32>
    %32 = math.exp %31 : vector<8x8xf32>
    %33 = arith.mulf %29, %15#1 : vector<8x1xf32>
    %cst_9 = arith.constant dense<0.000000e+00> : vector<8xf32>
    %34 = vector.multi_reduction <add>, %32, %cst_9 [1] : vector<8x8xf32> to vector<8xf32>
    %35 = vector.shape_cast %34 : vector<8xf32> to vector<8x1xf32>
    %36 = arith.addf %33, %35 : vector<8x1xf32>
    %37 = vector.broadcast %29 : vector<8x1xf32> to vector<8x8xf32>
    %38 = arith.mulf %37, %15#2 : vector<8x8xf32>
    %cst_10 = arith.constant dense<0.000000e+00> : vector<8x8xf32>
    %39 = tpu.matmul %32, %21, %cst_10 {dimension_numbers = #tpu.dot_dimension_numbers<[1], [0], [0], [1], [0, 0, 1, 1], [], []>} : vector<8x8xf32>, vector<8x8xf32>, vector<8x8xf32> -> vector<8x8xf32>
    %40 = arith.addf %38, %39 : vector<8x8xf32>
    %41 = tpu.reciprocal %36 {approx = true} : vector<8x1xf32> -> vector<8x1xf32>
    %42 = vector.broadcast %41 : vector<8x1xf32> to vector<8x8xf32>
    %43 = arith.mulf %40, %42 : vector<8x8xf32>
    %c0_11 = arith.constant 0 : index
    %c0_12 = arith.constant 0 : index
    %c0_13 = arith.constant 0 : index
    %44 = vector.load %arg3[%c0_11, %c0_12, %c0_13] : memref<1x8x32xf32, #tpu.memory_space<vmem>>, vector<1x8x8xf32>
    %45 = vector.shape_cast %44 : vector<1x8x8xf32> to vector<8x8xf32>
    %46 = vector.shape_cast %43 : vector<8x8xf32> to vector<1x8x8xf32>
    tpu.vector_store %arg3[%c0_11, %c0_12, %c0_13], %46 {strides = array<i32>} : memref<1x8x32xf32, #tpu.memory_space<vmem>>, vector<1x8x8xf32>,
    %c0_14 = arith.constant 0 : index
    %47 = arith.index_cast %1 : i32 to index
    %c8 = arith.constant 8 : index
    %48 = vector.load %arg2[%c0_14, %47, %c8] : memref<1x8x96xf32, #tpu.memory_space<vmem>>, vector<1x8x8xf32>
    %49 = vector.shape_cast %48 : vector<1x8x8xf32> to vector<8x8xf32>
    %cst_15 = arith.constant 0.353553385 : f32
    %50 = vector.broadcast %cst_15 : f32 to vector<8x8xf32>
    %51 = arith.mulf %49, %50 : vector<8x8xf32>
    %cst_16 = arith.constant 0xFF800000 : f32
    %52 = vector.broadcast %cst_16 : f32 to vector<8x1xf32>
    %cst_17 = arith.constant 0.000000e+00 : f32
    %53 = vector.broadcast %cst_17 : f32 to vector<8x1xf32>
    %cst_18 = arith.constant 0.000000e+00 : f32
    %54 = vector.broadcast %cst_18 : f32 to vector<8x8xf32>
    %c0_i32_19 = arith.constant 0 : i32
    %55 = arith.subi %arg1, %c0_i32_19 : i32
    %56 = arith.addi %c0_i32_19, %55 : i32
    %c1_i32_20 = arith.constant 1 : i32
    %57:3 = scf.for %arg4 = %c0_i32_19 to %56 step %c1_i32_20 iter_args(%arg5 = %52, %arg6 = %53, %arg7 = %54) -> (vector<8x1xf32>, vector<8x1xf32>, vector<8x8xf32>)  : i32 {
      %c8_i32_65 = arith.constant 8 : i32
      %173 = arith.muli %arg4, %c8_i32_65 : i32
      %174 = tpu.assume_multiple %173, 8 : i32
      %c0_66 = arith.constant 0 : index
      %175 = arith.index_cast %174 : i32 to index
      %c40_67 = arith.constant 40 : index
      %176 = vector.load %arg2[%c0_66, %175, %c40_67] : memref<1x8x96xf32, #tpu.memory_space<vmem>>, vector<1x8x8xf32>
      %177 = vector.shape_cast %176 : vector<1x8x8xf32> to vector<8x8xf32>
      %c0_68 = arith.constant 0 : index
      %178 = arith.index_cast %174 : i32 to index
      %c72_69 = arith.constant 72 : index
      %179 = vector.load %arg2[%c0_68, %178, %c72_69] : memref<1x8x96xf32, #tpu.memory_space<vmem>>, vector<1x8x8xf32>
      %180 = vector.shape_cast %179 : vector<1x8x8xf32> to vector<8x8xf32>
      %cst_70 = arith.constant dense<0.000000e+00> : vector<8x8xf32>
      %181 = tpu.matmul %51, %177, %cst_70 {dimension_numbers = #tpu.dot_dimension_numbers<[1], [1], [0], [0], [0, 0, 1, 0], [], []>} : vector<8x8xf32>, vector<8x8xf32>, vector<8x8xf32> -> vector<8x8xf32>
      %cst_71 = arith.constant dense<0xFF800000> : vector<8xf32>
      %182 = vector.multi_reduction <maximumf>, %181, %cst_71 [1] : vector<8x8xf32> to vector<8xf32>
      %183 = vector.shape_cast %182 : vector<8xf32> to vector<8x1xf32>
      %184 = arith.maximumf %arg5, %183 : vector<8x1xf32>
      %185 = arith.subf %arg5, %184 : vector<8x1xf32>
      %186 = math.exp %185 : vector<8x1xf32>
      %187 = vector.broadcast %184 : vector<8x1xf32> to vector<8x8xf32>
      %188 = arith.subf %181, %187 : vector<8x8xf32>
      %189 = math.exp %188 : vector<8x8xf32>
      %190 = arith.mulf %186, %arg6 : vector<8x1xf32>
      %cst_72 = arith.constant dense<0.000000e+00> : vector<8xf32>
      %191 = vector.multi_reduction <add>, %189, %cst_72 [1] : vector<8x8xf32> to vector<8xf32>
      %192 = vector.shape_cast %191 : vector<8xf32> to vector<8x1xf32>
      %193 = arith.addf %190, %192 : vector<8x1xf32>
      %194 = vector.broadcast %186 : vector<8x1xf32> to vector<8x8xf32>
      %195 = arith.mulf %194, %arg7 : vector<8x8xf32>
      %cst_73 = arith.constant dense<0.000000e+00> : vector<8x8xf32>
      %196 = tpu.matmul %189, %180, %cst_73 {dimension_numbers = #tpu.dot_dimension_numbers<[1], [0], [0], [1], [0, 0, 1, 1], [], []>} : vector<8x8xf32>, vector<8x8xf32>, vector<8x8xf32> -> vector<8x8xf32>
      %197 = arith.addf %195, %196 : vector<8x8xf32>
      scf.yield %184, %193, %197 : vector<8x1xf32>, vector<8x1xf32>, vector<8x8xf32>
    }
    %c0_21 = arith.constant 0 : index
    %58 = arith.index_cast %1 : i32 to index
    %c40 = arith.constant 40 : index
    %59 = vector.load %arg2[%c0_21, %58, %c40] : memref<1x8x96xf32, #tpu.memory_space<vmem>>, vector<1x8x8xf32>
    %60 = vector.shape_cast %59 : vector<1x8x8xf32> to vector<8x8xf32>
    %c0_22 = arith.constant 0 : index
    %61 = arith.index_cast %1 : i32 to index
    %c72 = arith.constant 72 : index
    %62 = vector.load %arg2[%c0_22, %61, %c72] : memref<1x8x96xf32, #tpu.memory_space<vmem>>, vector<1x8x8xf32>
    %63 = vector.shape_cast %62 : vector<1x8x8xf32> to vector<8x8xf32>
    %cst_23 = arith.constant dense<0.000000e+00> : vector<8x8xf32>
    %64 = tpu.matmul %51, %60, %cst_23 {dimension_numbers = #tpu.dot_dimension_numbers<[1], [1], [0], [0], [0, 0, 1, 0], [], []>} : vector<8x8xf32>, vector<8x8xf32>, vector<8x8xf32> -> vector<8x8xf32>
    %cst_24 = arith.constant 0xFF800000 : f32
    %65 = vector.broadcast %cst_24 : f32 to vector<8x8xf32>
    %66 = arith.select %4, %64, %65 : vector<8x8xi1>, vector<8x8xf32>
    %cst_25 = arith.constant dense<0xFF800000> : vector<8xf32>
    %67 = vector.multi_reduction <maximumf>, %66, %cst_25 [1] : vector<8x8xf32> to vector<8xf32>
    %68 = vector.shape_cast %67 : vector<8xf32> to vector<8x1xf32>
    %69 = arith.maximumf %57#0, %68 : vector<8x1xf32>
    %70 = arith.subf %57#0, %69 : vector<8x1xf32>
    %71 = math.exp %70 : vector<8x1xf32>
    %72 = vector.broadcast %69 : vector<8x1xf32> to vector<8x8xf32>
    %73 = arith.subf %66, %72 : vector<8x8xf32>
    %74 = math.exp %73 : vector<8x8xf32>
    %75 = arith.mulf %71, %57#1 : vector<8x1xf32>
    %cst_26 = arith.constant dense<0.000000e+00> : vector<8xf32>
    %76 = vector.multi_reduction <add>, %74, %cst_26 [1] : vector<8x8xf32> to vector<8xf32>
    %77 = vector.shape_cast %76 : vector<8xf32> to vector<8x1xf32>
    %78 = arith.addf %75, %77 : vector<8x1xf32>
    %79 = vector.broadcast %71 : vector<8x1xf32> to vector<8x8xf32>
    %80 = arith.mulf %79, %57#2 : vector<8x8xf32>
    %cst_27 = arith.constant dense<0.000000e+00> : vector<8x8xf32>
    %81 = tpu.matmul %74, %63, %cst_27 {dimension_numbers = #tpu.dot_dimension_numbers<[1], [0], [0], [1], [0, 0, 1, 1], [], []>} : vector<8x8xf32>, vector<8x8xf32>, vector<8x8xf32> -> vector<8x8xf32>
    %82 = arith.addf %80, %81 : vector<8x8xf32>
    %83 = tpu.reciprocal %78 {approx = true} : vector<8x1xf32> -> vector<8x1xf32>
    %84 = vector.broadcast %83 : vector<8x1xf32> to vector<8x8xf32>
    %85 = arith.mulf %82, %84 : vector<8x8xf32>
    %c0_28 = arith.constant 0 : index
    %c0_29 = arith.constant 0 : index
    %c8_30 = arith.constant 8 : index
    %86 = vector.load %arg3[%c0_28, %c0_29, %c8_30] : memref<1x8x32xf32, #tpu.memory_space<vmem>>, vector<1x8x8xf32>
    %87 = vector.shape_cast %86 : vector<1x8x8xf32> to vector<8x8xf32>
    %88 = vector.shape_cast %85 : vector<8x8xf32> to vector<1x8x8xf32>
    tpu.vector_store %arg3[%c0_28, %c0_29, %c8_30], %88 {strides = array<i32>} : memref<1x8x32xf32, #tpu.memory_space<vmem>>, vector<1x8x8xf32>,
    %c0_31 = arith.constant 0 : index
    %89 = arith.index_cast %1 : i32 to index
    %c16 = arith.constant 16 : index
    %90 = vector.load %arg2[%c0_31, %89, %c16] : memref<1x8x96xf32, #tpu.memory_space<vmem>>, vector<1x8x8xf32>
    %91 = vector.shape_cast %90 : vector<1x8x8xf32> to vector<8x8xf32>
    %cst_32 = arith.constant 0.353553385 : f32
    %92 = vector.broadcast %cst_32 : f32 to vector<8x8xf32>
    %93 = arith.mulf %91, %92 : vector<8x8xf32>
    %cst_33 = arith.constant 0xFF800000 : f32
    %94 = vector.broadcast %cst_33 : f32 to vector<8x1xf32>
    %cst_34 = arith.constant 0.000000e+00 : f32
    %95 = vector.broadcast %cst_34 : f32 to vector<8x1xf32>
    %cst_35 = arith.constant 0.000000e+00 : f32
    %96 = vector.broadcast %cst_35 : f32 to vector<8x8xf32>
    %c0_i32_36 = arith.constant 0 : i32
    %97 = arith.subi %arg1, %c0_i32_36 : i32
    %98 = arith.addi %c0_i32_36, %97 : i32
    %c1_i32_37 = arith.constant 1 : i32
    %99:3 = scf.for %arg4 = %c0_i32_36 to %98 step %c1_i32_37 iter_args(%arg5 = %94, %arg6 = %95, %arg7 = %96) -> (vector<8x1xf32>, vector<8x1xf32>, vector<8x8xf32>)  : i32 {
      %c8_i32_65 = arith.constant 8 : i32
      %173 = arith.muli %arg4, %c8_i32_65 : i32
      %174 = tpu.assume_multiple %173, 8 : i32
      %c0_66 = arith.constant 0 : index
      %175 = arith.index_cast %174 : i32 to index
      %c48_67 = arith.constant 48 : index
      %176 = vector.load %arg2[%c0_66, %175, %c48_67] : memref<1x8x96xf32, #tpu.memory_space<vmem>>, vector<1x8x8xf32>
      %177 = vector.shape_cast %176 : vector<1x8x8xf32> to vector<8x8xf32>
      %c0_68 = arith.constant 0 : index
      %178 = arith.index_cast %174 : i32 to index
      %c80_69 = arith.constant 80 : index
      %179 = vector.load %arg2[%c0_68, %178, %c80_69] : memref<1x8x96xf32, #tpu.memory_space<vmem>>, vector<1x8x8xf32>
      %180 = vector.shape_cast %179 : vector<1x8x8xf32> to vector<8x8xf32>
      %cst_70 = arith.constant dense<0.000000e+00> : vector<8x8xf32>
      %181 = tpu.matmul %93, %177, %cst_70 {dimension_numbers = #tpu.dot_dimension_numbers<[1], [1], [0], [0], [0, 0, 1, 0], [], []>} : vector<8x8xf32>, vector<8x8xf32>, vector<8x8xf32> -> vector<8x8xf32>
      %cst_71 = arith.constant dense<0xFF800000> : vector<8xf32>
      %182 = vector.multi_reduction <maximumf>, %181, %cst_71 [1] : vector<8x8xf32> to vector<8xf32>
      %183 = vector.shape_cast %182 : vector<8xf32> to vector<8x1xf32>
      %184 = arith.maximumf %arg5, %183 : vector<8x1xf32>
      %185 = arith.subf %arg5, %184 : vector<8x1xf32>
      %186 = math.exp %185 : vector<8x1xf32>
      %187 = vector.broadcast %184 : vector<8x1xf32> to vector<8x8xf32>
      %188 = arith.subf %181, %187 : vector<8x8xf32>
      %189 = math.exp %188 : vector<8x8xf32>
      %190 = arith.mulf %186, %arg6 : vector<8x1xf32>
      %cst_72 = arith.constant dense<0.000000e+00> : vector<8xf32>
      %191 = vector.multi_reduction <add>, %189, %cst_72 [1] : vector<8x8xf32> to vector<8xf32>
      %192 = vector.shape_cast %191 : vector<8xf32> to vector<8x1xf32>
      %193 = arith.addf %190, %192 : vector<8x1xf32>
      %194 = vector.broadcast %186 : vector<8x1xf32> to vector<8x8xf32>
      %195 = arith.mulf %194, %arg7 : vector<8x8xf32>
      %cst_73 = arith.constant dense<0.000000e+00> : vector<8x8xf32>
      %196 = tpu.matmul %189, %180, %cst_73 {dimension_numbers = #tpu.dot_dimension_numbers<[1], [0], [0], [1], [0, 0, 1, 1], [], []>} : vector<8x8xf32>, vector<8x8xf32>, vector<8x8xf32> -> vector<8x8xf32>
      %197 = arith.addf %195, %196 : vector<8x8xf32>
      scf.yield %184, %193, %197 : vector<8x1xf32>, vector<8x1xf32>, vector<8x8xf32>
    }
    %c0_38 = arith.constant 0 : index
    %100 = arith.index_cast %1 : i32 to index
    %c48 = arith.constant 48 : index
    %101 = vector.load %arg2[%c0_38, %100, %c48] : memref<1x8x96xf32, #tpu.memory_space<vmem>>, vector<1x8x8xf32>
    %102 = vector.shape_cast %101 : vector<1x8x8xf32> to vector<8x8xf32>
    %c0_39 = arith.constant 0 : index
    %103 = arith.index_cast %1 : i32 to index
    %c80 = arith.constant 80 : index
    %104 = vector.load %arg2[%c0_39, %103, %c80] : memref<1x8x96xf32, #tpu.memory_space<vmem>>, vector<1x8x8xf32>
    %105 = vector.shape_cast %104 : vector<1x8x8xf32> to vector<8x8xf32>
    %cst_40 = arith.constant dense<0.000000e+00> : vector<8x8xf32>
    %106 = tpu.matmul %93, %102, %cst_40 {dimension_numbers = #tpu.dot_dimension_numbers<[1], [1], [0], [0], [0, 0, 1, 0], [], []>} : vector<8x8xf32>, vector<8x8xf32>, vector<8x8xf32> -> vector<8x8xf32>
    %cst_41 = arith.constant 0xFF800000 : f32
    %107 = vector.broadcast %cst_41 : f32 to vector<8x8xf32>
    %108 = arith.select %4, %106, %107 : vector<8x8xi1>, vector<8x8xf32>
    %cst_42 = arith.constant dense<0xFF800000> : vector<8xf32>
    %109 = vector.multi_reduction <maximumf>, %108, %cst_42 [1] : vector<8x8xf32> to vector<8xf32>
    %110 = vector.shape_cast %109 : vector<8xf32> to vector<8x1xf32>
    %111 = arith.maximumf %99#0, %110 : vector<8x1xf32>
    %112 = arith.subf %99#0, %111 : vector<8x1xf32>
    %113 = math.exp %112 : vector<8x1xf32>
    %114 = vector.broadcast %111 : vector<8x1xf32> to vector<8x8xf32>
    %115 = arith.subf %108, %114 : vector<8x8xf32>
    %116 = math.exp %115 : vector<8x8xf32>
    %117 = arith.mulf %113, %99#1 : vector<8x1xf32>
    %cst_43 = arith.constant dense<0.000000e+00> : vector<8xf32>
    %118 = vector.multi_reduction <add>, %116, %cst_43 [1] : vector<8x8xf32> to vector<8xf32>
    %119 = vector.shape_cast %118 : vector<8xf32> to vector<8x1xf32>
    %120 = arith.addf %117, %119 : vector<8x1xf32>
    %121 = vector.broadcast %113 : vector<8x1xf32> to vector<8x8xf32>
    %122 = arith.mulf %121, %99#2 : vector<8x8xf32>
    %cst_44 = arith.constant dense<0.000000e+00> : vector<8x8xf32>
    %123 = tpu.matmul %116, %105, %cst_44 {dimension_numbers = #tpu.dot_dimension_numbers<[1], [0], [0], [1], [0, 0, 1, 1], [], []>} : vector<8x8xf32>, vector<8x8xf32>, vector<8x8xf32> -> vector<8x8xf32>
    %124 = arith.addf %122, %123 : vector<8x8xf32>
    %125 = tpu.reciprocal %120 {approx = true} : vector<8x1xf32> -> vector<8x1xf32>
    %126 = vector.broadcast %125 : vector<8x1xf32> to vector<8x8xf32>
    %127 = arith.mulf %124, %126 : vector<8x8xf32>
    %c0_45 = arith.constant 0 : index
    %c0_46 = arith.constant 0 : index
    %c16_47 = arith.constant 16 : index
    %128 = vector.load %arg3[%c0_45, %c0_46, %c16_47] : memref<1x8x32xf32, #tpu.memory_space<vmem>>, vector<1x8x8xf32>
    %129 = vector.shape_cast %128 : vector<1x8x8xf32> to vector<8x8xf32>
    %130 = vector.shape_cast %127 : vector<8x8xf32> to vector<1x8x8xf32>
    tpu.vector_store %arg3[%c0_45, %c0_46, %c16_47], %130 {strides = array<i32>} : memref<1x8x32xf32, #tpu.memory_space<vmem>>, vector<1x8x8xf32>,
    %c0_48 = arith.constant 0 : index
    %131 = arith.index_cast %1 : i32 to index
    %c24 = arith.constant 24 : index
    %132 = vector.load %arg2[%c0_48, %131, %c24] : memref<1x8x96xf32, #tpu.memory_space<vmem>>, vector<1x8x8xf32>
    %133 = vector.shape_cast %132 : vector<1x8x8xf32> to vector<8x8xf32>
    %cst_49 = arith.constant 0.353553385 : f32
    %134 = vector.broadcast %cst_49 : f32 to vector<8x8xf32>
    %135 = arith.mulf %133, %134 : vector<8x8xf32>
    %cst_50 = arith.constant 0xFF800000 : f32
    %136 = vector.broadcast %cst_50 : f32 to vector<8x1xf32>
    %cst_51 = arith.constant 0.000000e+00 : f32
    %137 = vector.broadcast %cst_51 : f32 to vector<8x1xf32>
    %cst_52 = arith.constant 0.000000e+00 : f32
    %138 = vector.broadcast %cst_52 : f32 to vector<8x8xf32>
    %c0_i32_53 = arith.constant 0 : i32
    %139 = arith.subi %arg1, %c0_i32_53 : i32
    %140 = arith.addi %c0_i32_53, %139 : i32
    %c1_i32_54 = arith.constant 1 : i32
    %141:3 = scf.for %arg4 = %c0_i32_53 to %140 step %c1_i32_54 iter_args(%arg5 = %136, %arg6 = %137, %arg7 = %138) -> (vector<8x1xf32>, vector<8x1xf32>, vector<8x8xf32>)  : i32 {
      %c8_i32_65 = arith.constant 8 : i32
      %173 = arith.muli %arg4, %c8_i32_65 : i32
      %174 = tpu.assume_multiple %173, 8 : i32
      %c0_66 = arith.constant 0 : index
      %175 = arith.index_cast %174 : i32 to index
      %c56_67 = arith.constant 56 : index
      %176 = vector.load %arg2[%c0_66, %175, %c56_67] : memref<1x8x96xf32, #tpu.memory_space<vmem>>, vector<1x8x8xf32>
      %177 = vector.shape_cast %176 : vector<1x8x8xf32> to vector<8x8xf32>
      %c0_68 = arith.constant 0 : index
      %178 = arith.index_cast %174 : i32 to index
      %c88_69 = arith.constant 88 : index
      %179 = vector.load %arg2[%c0_68, %178, %c88_69] : memref<1x8x96xf32, #tpu.memory_space<vmem>>, vector<1x8x8xf32>
      %180 = vector.shape_cast %179 : vector<1x8x8xf32> to vector<8x8xf32>
      %cst_70 = arith.constant dense<0.000000e+00> : vector<8x8xf32>
      %181 = tpu.matmul %135, %177, %cst_70 {dimension_numbers = #tpu.dot_dimension_numbers<[1], [1], [0], [0], [0, 0, 1, 0], [], []>} : vector<8x8xf32>, vector<8x8xf32>, vector<8x8xf32> -> vector<8x8xf32>
      %cst_71 = arith.constant dense<0xFF800000> : vector<8xf32>
      %182 = vector.multi_reduction <maximumf>, %181, %cst_71 [1] : vector<8x8xf32> to vector<8xf32>
      %183 = vector.shape_cast %182 : vector<8xf32> to vector<8x1xf32>
      %184 = arith.maximumf %arg5, %183 : vector<8x1xf32>
      %185 = arith.subf %arg5, %184 : vector<8x1xf32>
      %186 = math.exp %185 : vector<8x1xf32>
      %187 = vector.broadcast %184 : vector<8x1xf32> to vector<8x8xf32>
      %188 = arith.subf %181, %187 : vector<8x8xf32>
      %189 = math.exp %188 : vector<8x8xf32>
      %190 = arith.mulf %186, %arg6 : vector<8x1xf32>
      %cst_72 = arith.constant dense<0.000000e+00> : vector<8xf32>
      %191 = vector.multi_reduction <add>, %189, %cst_72 [1] : vector<8x8xf32> to vector<8xf32>
      %192 = vector.shape_cast %191 : vector<8xf32> to vector<8x1xf32>
      %193 = arith.addf %190, %192 : vector<8x1xf32>
      %194 = vector.broadcast %186 : vector<8x1xf32> to vector<8x8xf32>
      %195 = arith.mulf %194, %arg7 : vector<8x8xf32>
      %cst_73 = arith.constant dense<0.000000e+00> : vector<8x8xf32>
      %196 = tpu.matmul %189, %180, %cst_73 {dimension_numbers = #tpu.dot_dimension_numbers<[1], [0], [0], [1], [0, 0, 1, 1], [], []>} : vector<8x8xf32>, vector<8x8xf32>, vector<8x8xf32> -> vector<8x8xf32>
      %197 = arith.addf %195, %196 : vector<8x8xf32>
      scf.yield %184, %193, %197 : vector<8x1xf32>, vector<8x1xf32>, vector<8x8xf32>
    }
    %c0_55 = arith.constant 0 : index
    %142 = arith.index_cast %1 : i32 to index
    %c56 = arith.constant 56 : index
    %143 = vector.load %arg2[%c0_55, %142, %c56] : memref<1x8x96xf32, #tpu.memory_space<vmem>>, vector<1x8x8xf32>
    %144 = vector.shape_cast %143 : vector<1x8x8xf32> to vector<8x8xf32>
    %c0_56 = arith.constant 0 : index
    %145 = arith.index_cast %1 : i32 to index
    %c88 = arith.constant 88 : index
    %146 = vector.load %arg2[%c0_56, %145, %c88] : memref<1x8x96xf32, #tpu.memory_space<vmem>>, vector<1x8x8xf32>
    %147 = vector.shape_cast %146 : vector<1x8x8xf32> to vector<8x8xf32>
    %cst_57 = arith.constant dense<0.000000e+00> : vector<8x8xf32>
    %148 = tpu.matmul %135, %144, %cst_57 {dimension_numbers = #tpu.dot_dimension_numbers<[1], [1], [0], [0], [0, 0, 1, 0], [], []>} : vector<8x8xf32>, vector<8x8xf32>, vector<8x8xf32> -> vector<8x8xf32>
    %cst_58 = arith.constant 0xFF800000 : f32
    %149 = vector.broadcast %cst_58 : f32 to vector<8x8xf32>
    %150 = arith.select %4, %148, %149 : vector<8x8xi1>, vector<8x8xf32>
    %cst_59 = arith.constant dense<0xFF800000> : vector<8xf32>
    %151 = vector.multi_reduction <maximumf>, %150, %cst_59 [1] : vector<8x8xf32> to vector<8xf32>
    %152 = vector.shape_cast %151 : vector<8xf32> to vector<8x1xf32>
    %153 = arith.maximumf %141#0, %152 : vector<8x1xf32>
    %154 = arith.subf %141#0, %153 : vector<8x1xf32>
    %155 = math.exp %154 : vector<8x1xf32>
    %156 = vector.broadcast %153 : vector<8x1xf32> to vector<8x8xf32>
    %157 = arith.subf %150, %156 : vector<8x8xf32>
    %158 = math.exp %157 : vector<8x8xf32>
    %159 = arith.mulf %155, %141#1 : vector<8x1xf32>
    %cst_60 = arith.constant dense<0.000000e+00> : vector<8xf32>
    %160 = vector.multi_reduction <add>, %158, %cst_60 [1] : vector<8x8xf32> to vector<8xf32>
    %161 = vector.shape_cast %160 : vector<8xf32> to vector<8x1xf32>
    %162 = arith.addf %159, %161 : vector<8x1xf32>
    %163 = vector.broadcast %155 : vector<8x1xf32> to vector<8x8xf32>
    %164 = arith.mulf %163, %141#2 : vector<8x8xf32>
    %cst_61 = arith.constant dense<0.000000e+00> : vector<8x8xf32>
    %165 = tpu.matmul %158, %147, %cst_61 {dimension_numbers = #tpu.dot_dimension_numbers<[1], [0], [0], [1], [0, 0, 1, 1], [], []>} : vector<8x8xf32>, vector<8x8xf32>, vector<8x8xf32> -> vector<8x8xf32>
    %166 = arith.addf %164, %165 : vector<8x8xf32>
    %167 = tpu.reciprocal %162 {approx = true} : vector<8x1xf32> -> vector<8x1xf32>
    %168 = vector.broadcast %167 : vector<8x1xf32> to vector<8x8xf32>
    %169 = arith.mulf %166, %168 : vector<8x8xf32>
    %c0_62 = arith.constant 0 : index
    %c0_63 = arith.constant 0 : index
    %c24_64 = arith.constant 24 : index
    %170 = vector.load %arg3[%c0_62, %c0_63, %c24_64] : memref<1x8x32xf32, #tpu.memory_space<vmem>>, vector<1x8x8xf32>
    %171 = vector.shape_cast %170 : vector<1x8x8xf32> to vector<8x8xf32>
    %172 = vector.shape_cast %169 : vector<8x8xf32> to vector<1x8x8xf32>
    tpu.vector_store %arg3[%c0_62, %c0_63, %c24_64], %172 {strides = array<i32>} : memref<1x8x32xf32, #tpu.memory_space<vmem>>, vector<1x8x8xf32>,
    return
  }
  func.func @transform_0(%arg0: i32, %arg1: i32) -> (i32, i32, i32) {
    %c0_i32 = arith.constant 0 : i32
    %c0_i32_0 = arith.constant 0 : i32
    %c0_i32_1 = arith.constant 0 : i32
    return %arg0, %c0_i32, %c0_i32_0 : i32, i32, i32
  }
  func.func @transform_1(%arg0: i32, %arg1: i32) -> (i32, i32, i32) {
    %c0_i32 = arith.constant 0 : i32
    %c0_i32_0 = arith.constant 0 : i32
    return %arg0, %arg1, %c0_i32 : i32, i32, i32
  }
}

</mosaic_0001>

<bundles_post_ra>
// kernel: causal_self_attention.3
= control target key start
LH: loop header
LB: loop body
LE: loop exit
PB: predicated region body
PF: predicated region fallthrough
CT: control target
= control target key end

     0   :  { %8 = vsyncpa [#allocation4], 0  ;;  %s311_s0 = inlined_call_operand.hbm [shape: f32[16,32], index: 0, kind: input, shape index: {}]   ;;  %s312_s1 = inlined_call_operand.hbm [shape: f32[32,96], index: 1, kind: input, shape index: {}]   ;;  %s313_s2 = inlined_call_operand.vmem [shape: f32[1,96], index: 2, kind: input, shape index: {}]   ;;  %s314_s3 = inlined_call_operand.vmem [shape: f32[16,96], index: 3, kind: output, shape index: {}]  }
   0x1   :  { %9 = vsyncpa [#allocation6], 0  ;;  %s247_s12 = smov [#allocation3]   ;;  %s199_s16 = scalar_lea.hbm %s311_s0, 256 }
   0x2   :  { %s15_s13 = sshll.u32 %s247_s12, 4  ;;  %p200_p0 = scmp.ne.s32.totalorder %s311_s0, %s199_s16  ;;  %s16_s13 = int_to_ptr.vmem [resolvable:$true] %s15_s13 }
   0x3   :  { %p203_p1 = scmp.lt.u32.totalorder %s199_s16, %s311_s0 }
   0x5   :  { %p205_p2 = pnand %p203_p1, %p200_p0 }
   0x7   :  { %208 = shalt.err (!%p205_p2)
}
   0x8   :  { %s209_s21 = scalar_lea.vmem %s16_s13, 256  ;;  %p214_p4 = scmp.lt.s32.totalorder %s16_s13, %s16_s13 }
   0x9   :  { %p210_p3 = scmp.ne.s32.totalorder %s16_s13, %s209_s21  ;;  %p215_p5 = scmp.lt.s32.totalorder %s209_s21, %s209_s21 }
   0xb   :  { %p216_p6 = por %p215_p5, %p214_p4 }
   0xd   :  { %p217_p7 = pnand %p216_p6, %p210_p3 }
   0xf   :  { %220 = shalt.err (!%p217_p7)
}
  0x10   :  { %s248_s22 = smov 128   ;;  %s249_s23 = smov 8  }
  0x11   :  { %21 = dma.hbm_to_vmem [thread:$0]  %s311_s0, 256, %s16_s13, [#allocation4], %s248_s22, %s248_s22, %s249_s23  }
  0x12   :  { %s250_s26 = smov [#allocation5]   ;;  %s221_s30 = scalar_lea.hbm %s312_s1, 512 }
  0x13   :  { %s27_s27 = sshll.u32 %s250_s26, 4  ;;  %p222_p8 = scmp.ne.s32.totalorder %s312_s1, %s221_s30  ;;  %s28_s27 = int_to_ptr.vmem [resolvable:$true] %s27_s27 }
  0x14   :  { %p225_p9 = scmp.lt.u32.totalorder %s221_s30, %s312_s1 }
  0x16   :  { %p227_p10 = pnand %p225_p9, %p222_p8 }
  0x18   :  { %230 = shalt.err (!%p227_p10)
}
  0x19   :  { %s231_s8 = scalar_lea.vmem %s28_s27, 512  ;;  %p236_p12 = scmp.lt.s32.totalorder %s28_s27, %s28_s27 }
  0x1a   :  { %p232_p11 = scmp.ne.s32.totalorder %s28_s27, %s231_s8  ;;  %p237_p13 = scmp.lt.s32.totalorder %s231_s8, %s231_s8 }
  0x1c   :  { %p238_p0 = por %p237_p13, %p236_p12 }
  0x1e   :  { %p239_p1 = pnand %p238_p0, %p232_p11 }
  0x20   :  { %242 = shalt.err (!%p239_p1)
}
  0x21   :  { %33 = dma.hbm_to_vmem [thread:$0]  %s312_s1, 512, %s28_s27, [#allocation6], %s248_s22, %s248_s22, %s249_s23  }
  0x22   :  { %243 = dma.done.wait [#allocation4], 256  }
  0x23   :  { %244 = vsyncadd [#allocation4], 4294967040 }
  0x24   :  { %245 = dma.done.wait [#allocation6], 512  }
  0x25   :  { %246 = vsyncadd [#allocation6], 4294966784  ;;  %vm46_vm0 = vcmask 785408   ;;  %v251_v0 = vmov 0.0   ;;  %vm57_vm1 = vcmask 261120   ;;  %v53_v1 = vld [vmem:[#allocation5] sm:$0xff] }
  0x26   :  { %48 = vst.msk [vmem:[#allocation2 + $0x8] sm:$0xff] %vm46_vm0, %v251_v0  ;;  %47 = vst.msk [vmem:[#allocation2] sm:$0xff] %vm46_vm0, %v251_v0  ;;  %v54_v2 = vld [vmem:[#allocation5 + $0x8] sm:$0xff]  ;;  %v55_v3 = vld [vmem:[#allocation5 + $0x10] sm:$0xff] }
  0x27   :  { %v186_v4 = vpack.c.bf16 %v54_v2, %v53_v1  ;;  %v56_v5 = vld [vmem:[#allocation5 + $0x18] sm:$0xff]  ;;  %v51_v6 = vld [vmem:[#allocation3] sm:$0xff]  ;;  %v168_v15 = vld [vmem:[%s313_s2] ss:$0 sm:$0xff] }
  0x28   :  { %v190_v7 = vpack.c.bf16 %v56_v5, %v55_v3  ;;  %183 = vmatprep.mubr.msk.f32.mxu0 %vm57_vm1, %v51_v6  ;;  %v52_v8 = vld [vmem:[#allocation3 + $0x8] sm:$0xff] }
  0x29   :  { %187 = vmatprep.subr.bf16.mxu0 %v186_v4 }
  0x2a   :  { %189 = vmatpush3.bf16.msra.mxu0 %v186_v4 }
  0x2b   :  { %191 = vmatprep.subr.bf16.mxu0 %v190_v7 }
  0x2d   :  { %v50_v9 = vld [vmem:[#allocation2 + $0x8] sm:$0xff]  ;;  %v49_v10 = vld [vmem:[#allocation2] sm:$0xff] }
  0x2e   :  { %193 = vmatpush3.bf16.msra.mxu0 %v190_v7 }
  0x31   :  { %184 = vmatmul.mubr.msk.f32.vlgmr.msra.gmra.mrb[0].mxu0 %vm57_vm1, %v52_v8 }
 0x104   :  { %v185_v11 = vpop.f32.mrb[0].mxu0 }
 0x105   :  { %v140_v12 = vadd.f32 %v185_v11, %v50_v9  ;;  %v130_v13 = vpop.f32.mrb[1].mxu0 }
 0x106   :  { %v139_v14 = vadd.f32 %v130_v13, %v49_v10 }
 0x107   :  { %143 = vst.msk [vmem:[#allocation2 + $0x8] sm:$0xff] %vm46_vm0, %v140_v12 }
 0x108   :  { %142 = vst.msk [vmem:[#allocation2] sm:$0xff] %vm46_vm0, %v139_v14 }
 0x10e   :  { %v148_v16 = vld [vmem:[#allocation2 + $0x8] sm:$0xff] }
 0x10f   :  { %v157_v17 = vadd.f32 %v168_v15, %v148_v16  ;;  %v147_v18 = vld [vmem:[#allocation2] sm:$0xff] }
 0x110   :  { %v156_v19 = vadd.f32 %v168_v15, %v147_v18 }
 0x111   :  { %159 = vst.msk [vmem:[%s314_s3 + $0x8] sm:$0xff] %vm46_vm0, %v157_v17 }
 0x112   :  { %158 = vst.msk [vmem:[%s314_s3] sm:$0xff] %vm46_vm0, %v156_v19 }
 0x113   :  { %164 = vsyncpa [#allocation4], 1 }
 0x114   :  { %165 = vsyncpa [#allocation6], 1 }

// kernel: causal_self_attention.5
= control target key start
LH: loop header
LB: loop body
LE: loop exit
PB: predicated region body
PF: predicated region fallthrough
CT: control target
= control target key end

     0   :  { %vm19_vm0 = vcmask 261120   ;;  %v204_v6 = vmov 0.0   ;;  %s269_s0 = inlined_call_operand.vmem [shape: f32[16,32], index: 0, kind: input, shape index: {}]   ;;  %s270_s1 = inlined_call_operand.vmem [shape: f32[32,32], index: 1, kind: input, shape index: {}]   ;;  %s271_s2 = inlined_call_operand.vmem [shape: f32[1,32], index: 2, kind: input, shape index: {}]   ;;  %s272_s3 = inlined_call_operand.hbm [shape: f32[16,32], index: 3, kind: output, shape index: {}]  }
   0x1   :  { %v26_v0 = vld [vmem:[%s270_s1] sm:$0xff]  ;;  %v27_v1 = vld [vmem:[%s270_s1 + $0x8] sm:$0xff]  ;;  %v28_v2 = vld [vmem:[%s270_s1 + $0x10] sm:$0xff]  ;;  %21 = vst.msk [vmem:[#allocation2 + $0x8] sm:$0xff] %vm19_vm0, %v204_v6 }
   0x2   :  { %v168_v3 = vpack.c.bf16 %v27_v1, %v26_v0  ;;  %v29_v4 = vld [vmem:[%s270_s1 + $0x18] sm:$0xff]  ;;  %v24_v5 = vld [vmem:[%s269_s0] sm:$0xff]  ;;  %20 = vst.msk [vmem:[#allocation2] sm:$0xff] %vm19_vm0, %v204_v6 }
   0x3   :  { %v172_v7 = vpack.c.bf16 %v29_v4, %v28_v2  ;;  %165 = vmatprep.mubr.msk.f32.mxu0 %vm19_vm0, %v24_v5 }
   0x4   :  { %8 = vsyncpa [#allocation4], 0  ;;  %169 = vmatprep.subr.bf16.mxu0 %v168_v3  ;;  %v25_v8 = vld [vmem:[%s269_s0 + $0x8] sm:$0xff]  ;;  %v150_v15 = vld [vmem:[%s271_s2] ss:$0 sm:$0xff]  ;;  %s205_s25 = smov [#allocation3]  }
   0x5   :  { %171 = vmatpush3.bf16.msra.mxu0 %v168_v3  ;;  %s137_s26 = sshll.u32 %s205_s25, 4  ;;  %s138_s26 = int_to_ptr.vmem [resolvable:$true] %s137_s26 }
   0x6   :  { %173 = vmatprep.subr.bf16.mxu0 %v172_v7  ;;  %s180_s0 = scalar_lea.vmem %s138_s26, 256  ;;  %p185_p1 = scmp.lt.s32.totalorder %s138_s26, %s138_s26 }
   0x7   :  { %p181_p0 = scmp.ne.s32.totalorder %s138_s26, %s180_s0  ;;  %p186_p2 = scmp.lt.s32.totalorder %s180_s0, %s180_s0 }
   0x8   :  { %v23_v9 = vld [vmem:[#allocation2 + $0x8] sm:$0xff] }
   0x9   :  { %175 = vmatpush3.bf16.msra.mxu0 %v172_v7  ;;  %v22_v10 = vld [vmem:[#allocation2] sm:$0xff]  ;;  %p187_p3 = por %p186_p2, %p185_p1 }
   0xb   :  { %p188_p4 = pnand %p187_p3, %p181_p0 }
   0xc   :  { %166 = vmatmul.mubr.msk.f32.vlgmr.msra.gmra.mrb[0].mxu0 %vm19_vm0, %v25_v8 }
  0xdf   :  { %v167_v11 = vpop.f32.mrb[0].mxu0 }
  0xe0   :  { %v113_v12 = vadd.f32 %v167_v11, %v23_v9  ;;  %v103_v13 = vpop.f32.mrb[1].mxu0 }
  0xe1   :  { %v112_v14 = vadd.f32 %v103_v13, %v22_v10 }
  0xe2   :  { %115 = vst.msk [vmem:[#allocation2 + $0x8] sm:$0xff] %vm19_vm0, %v113_v12 }
  0xe3   :  { %114 = vst.msk [vmem:[#allocation2] sm:$0xff] %vm19_vm0, %v112_v14 }
  0xe9   :  { %v120_v16 = vld [vmem:[#allocation2 + $0x8] sm:$0xff] }
  0xea   :  { %v119_v17 = vld [vmem:[#allocation2] sm:$0xff]  ;;  %v129_v18 = vadd.f32 %v150_v15, %v120_v16 }
  0xeb   :  { %v128_v19 = vadd.f32 %v150_v15, %v119_v17 }
  0xec   :  { %131 = vst.msk [vmem:[#allocation3 + $0x8] sm:$0xff] %vm19_vm0, %v129_v18 }
  0xed   :  { %130 = vst.msk [vmem:[#allocation3] sm:$0xff] %vm19_vm0, %v128_v19 }
  0xee   :  { %191 = shalt.err (!%p188_p4)
}
  0xef   :  { %s192_s28 = scalar_lea.hbm %s272_s3, 256 }
  0xf0   :  { %p193_p5 = scmp.ne.s32.totalorder %s272_s3, %s192_s28  ;;  %p196_p6 = scmp.lt.u32.totalorder %s192_s28, %s272_s3 }
  0xf2   :  { %p198_p7 = pnand %p196_p6, %p193_p5 }
  0xf4   :  { %201 = shalt.err (!%p198_p7)
}
  0xf5   :  { %s206_s6 = smov 128   ;;  %s207_s7 = smov 8  }
  0xf6   :  { %143 = dma.vmem_to_hbm [thread:$0]  %s138_s26, 256, %s272_s3, [#allocation4], %s206_s6, %s206_s6, %s207_s7  }
  0xf7   :  { %202 = dma.done.wait [#allocation4], 256  }
  0xf8   :  { %203 = vsyncadd [#allocation4], 4294967040 }
  0xf9   :  { %147 = vsyncpa [#allocation4], 1 }

// kernel: causal_self_attention.4
= control target key start
LH: loop header
LB: loop body
LE: loop exit
PB: predicated region body
PF: predicated region fallthrough
CT: control target
= control target key end

     0   :  { %s1952_s6 = smov 0   ;;  %s1954_s7 = smov 0   ;;  %s2069_s0 = inlined_call_operand.vmem [shape: f32[2,8,96], index: 0, kind: input, shape index: {}]   ;;  %s2070_s1 = inlined_call_operand.vmem [shape: f32[2,8,32], index: 1, kind: output, shape index: {}]  }
   0x1   :  { %s1956_s8 = smov 0  }
   0x2 LB: > { %s23_s9 = sadd.s32 1, %s1920_s7  ;;  %p1749_p0 = scmp.ge.s32.totalorder %s1924_s8, 1  ;;  %s1924_s8 = sphi %s1956_s8, %s11_s8   ;;  %s1920_s7 = sphi %s1954_s7, %s2072_s7   ;;  %s1916_s6 = sphi %s1952_s6, %s2071_s6  }
   0x3   : > { %p25_p1 = scmp.ge.s32.totalorder %s23_s9, 2  ;;  %p100_p2 = scmp.lt.s32.totalorder %s1924_s8, 3 }
   0x5   : > { %s2074_s9 = smov (%p25_p1, %s23_s9), 0  ;;  %p101_p3 = pnand %p1749_p0, %p100_p2 }
   0x6   : > { %p121_p4 = scmp.lt.s32.totalorder (!%p101_p3), %s1916_s6, 1  ;;  %v1926_v0 = vmov (!%p101_p3), 0.0   ;;  %vm1927_vm0 = vmmov (!%p101_p3), 0   ;;  %s1928_s14 = smov (!%p101_p3), 96   ;;  %vm328_vm1 = vcmask (!%p101_p3), 64512   ;;  %v133_v4 = vlaneseq (!%p101_p3) }
   0x7   : > { %104 = sbr.rel (%p101_p3) target bundleno = 1222 (0x4c6), region = 24  ;;  %1798 = vmatprep.subr.mxu0 (!%p101_p3), %v1926_v0  ;;  %1800 = vmatprep.mubr.msk.f32.mxu0 (!%p101_p3), %vm1927_vm0, %v1926_v0  ;;  %s1929_s15 = smov (!%p101_p3), 64   ;;  %vm868_vm3 = vcmask (!%p101_p3), 130112   ;;  %vm1237_vm4 = vcmask (!%p101_p3), 195712   ;;  %vm1606_vm5 = vcmask (!%p101_p3), 261312  }
   0x8   : > { %1803 = vmatprep.subr.mxu1 (!%p101_p3), %v1926_v0  ;;  %1805 = vmatprep.mubr.msk.f32.mxu1 (!%p101_p3), %vm1927_vm0, %v1926_v0  ;;  %s1930_s16 = smov (!%p101_p3), 88   ;;  %s1931_s17 = smov (!%p101_p3), 120   ;;  %v134_v5 = vshrl.u32 (!%p101_p3), %v133_v4, 7  ;;  %v136_v6 = vand.u32 (!%p101_p3), 127, %v133_v4 }
   0x9   : > { %s1932_s18 = smov (!%p101_p3), 80   ;;  %s1933_s19 = smov (!%p101_p3), 112  }
   0xa   : > { %s1934_s20 = smov (!%p101_p3), 72   ;;  %s1935_s21 = smov (!%p101_p3), 104   ;;  %vm137_vm2 = vcmp.ge.s32.totalorder (!%p101_p3), %v134_v5, %v136_v6 }
   0xb   : > { %s1936_s22 = smov (!%p101_p3), 56   ;;  %s1937_s23 = smov (!%p101_p3), 48  }
   0xc   : > { %s1938_s24 = smov (!%p101_p3), 40   ;;  %s1939_s28 = smov (!%p101_p3), 8  }
   0xd   : > { %s1940_s29 = smov (!%p101_p3), 16   ;;  %s1941_s30 = smov (!%p101_p3), 24  }
   0xe   : > { %s2076_s6 = smov (!%p121_p4, %s1916_s6), 1 }
   0xf   : > { %s1750_s10 = sshll.u32 %s2076_s6, 3 }
  0x10   : > { %s124_s13 = scalar_lea.vmem %s2069_s0, %s1750_s10  ;;  %s2053_s27 = scalar_lea.vmem %s2070_s1, %s1750_s10 }
  0x11   : > { %v1984_v1 = vld [vmem:[%s124_s13] sm:$0xff] }
  0x12   : > { %326 = vrot.lane.b32.xlu0 %v1984_v1, %s1928_s14  ;;  %v140_v2 = vmul.f32 0.35355338, %v1984_v1  ;;  %421 = vrot.lane.b32.xlu1 %v1984_v1, %s1929_s15 }
  0x16   : > { %692 = vrot.lane.b32.xlu1 %v1984_v1, %s1930_s16 }
  0x1a   : > { %689 = vrot.lane.b32.xlu1 %v140_v2, %s1931_s17 }
  0x1e   : > { %1061 = vrot.lane.b32.xlu1 %v1984_v1, %s1932_s18 }
  0x22   : > { %1058 = vrot.lane.b32.xlu1 %v140_v2, %s1933_s19 }
  0x26   : > { %1430 = vrot.lane.b32.xlu1 %v1984_v1, %s1934_s20 }
  0x2a   : > { %1427 = vrot.lane.b32.xlu1 %v140_v2, %s1935_s21 }
  0x84   : > { %v327_v3 = vpop.permute.xlu0 %326  ;;  %v422_v11 = vpop.permute.xlu1 %421 }
  0x85   : > { %1799 = vmatpush3.xpose.msk.msra.mxu0 %vm328_vm1, %v327_v3  ;;  %1804 = vmatpush3.msra.mxu1 %v422_v11 }
  0x86   : > { %1813 = vmatprep.subr.mxu0 %v1926_v0  ;;  %1808 = vmatprep.subr.mxu1 %v1926_v0 }
  0x88   : > { %1801 = vmatmul.mubr.msk.f32.vlgmr.msra.gmra.mrb[0].mxu0 %vm328_vm1, %v140_v2  ;;  %v693_v12 = vpop.permute.xlu1 %692 }
  0x89   : > { %1815 = vmatprep.mubr.msk.f32.mxu0 %vm1927_vm0, %v1926_v0 }
  0x8c   : > { %v690_v15 = vpop.permute.xlu1 %689 }
  0x90   : > { %v1062_v17 = vpop.permute.xlu1 %1061 }
  0x94   : > { %v1059_v18 = vpop.permute.xlu1 %1058 }
  0x98   : > { %v1431_v20 = vpop.permute.xlu1 %1430 }
  0x9c   : > { %v1428_v21 = vpop.permute.xlu1 %1427 }
 0x15b   : > { %v400_v7 = vpop.f32.mrb[0].mxu0 }
 0x15c   : > { %v404_v8 = vsel %vm137_vm2, %v400_v7, -inf  ;;  %v1802_v9 = vpop.f32.mrb[1].mxu0 }
 0x15d   : > { %v405_v10 = vsel %vm328_vm1, %v404_v8, -inf }
 0x15e   : > { %406 = vmax.xlane.f32.xlu0 %v405_v10 }
 0x174   : > { %785 = vrot.lane.b32.xlu0 %v1984_v1, %s1936_s22 }
 0x1eb   : > { %v2001_v13 = vpop.xlane.xlu0 %406 }
 0x1ec   : > { %v412_v14 = vsub.f32 %v404_v8, %v2001_v13  ;;  %v409_v55 = vsub.f32 -inf, %v2001_v13 }
 0x1ee   : > { %v413_v16 = vmul.f32 1.442695, %v412_v14  ;;  %v410_v56 = vmul.f32 1.442695, %v409_v55 }
 0x1ef   : > { %v786_v22 = vpop.permute.xlu0 %785 }
 0x1f0   : > { %1878 = vpow2.f32 %v413_v16  ;;  %1814 = vmatpush3.msra.mxu0 %v786_v22 }
 0x1f1   : > { %1823 = vmatprep.subr.mxu0 %v1926_v0 }
 0x1fa   : > { %v2004_v19 = vpop.eup %1878 }
 0x1fb   : > { %1806 = vmatmul.mubr.msk.f32.vlgmr.msra.gmra.mrb[0].mxu1 %vm328_vm1, %v2004_v19  ;;  %v416_v54 = vsel %vm328_vm1, %v2004_v19, 0.0 }
 0x1fc   : > { %1809 = vmatpush3.xpose.msk.msra.mxu1 %vm328_vm1, %v693_v12  ;;  %1810 = vmatprep.mubr.msk.f32.mxu1 %vm1927_vm0, %v1926_v0 }
 0x1fd   : > { %1818 = vmatprep.subr.mxu1 %v1926_v0 }
 0x1ff   : > { %1811 = vmatmul.mubr.msk.f32.vlgmr.msra.gmra.mrb[2].mxu1 %vm328_vm1, %v690_v15 }
 0x200   : > { %1819 = vmatpush3.xpose.msk.msra.mxu1 %vm328_vm1, %v1062_v17  ;;  %1820 = vmatprep.mubr.msk.f32.mxu1 %vm1927_vm0, %v1926_v0 }
 0x201   : > { %1828 = vmatprep.subr.mxu1 %v1926_v0 }
 0x203   : > { %1821 = vmatmul.mubr.msk.f32.vlgmr.msra.gmra.mrb[4].mxu1 %vm328_vm1, %v1059_v18 }
 0x204   : > { %1829 = vmatpush3.xpose.msk.msra.mxu1 %vm328_vm1, %v1431_v20  ;;  %1830 = vmatprep.mubr.msk.f32.mxu1 %vm1927_vm0, %v1926_v0 }
 0x207   : > { %1831 = vmatmul.mubr.msk.f32.vlgmr.msra.gmra.mrb[6].mxu1 %vm328_vm1, %v1428_v21 }
 0x2ce   : > { %v2023_v23 = vpop.f32.mrb[0].mxu1 }
 0x2cf   : > { %v1807_v24 = vpop.f32.mrb[1].mxu1 }
 0x2d2   : > { %v764_v25 = vpop.f32.mrb[2].mxu1 }
 0x2d3   : > { %v768_v26 = vsel %vm137_vm2, %v764_v25, -inf  ;;  %v1812_v27 = vpop.f32.mrb[3].mxu1 }
 0x2d4   : > { %v769_v28 = vsel %vm328_vm1, %v768_v26, -inf }
 0x2d5   : > { %770 = vmax.xlane.f32.xlu1 %v769_v28 }
 0x2d6   : > { %v1133_v29 = vpop.f32.mrb[4].mxu1 }
 0x2d7   : > { %v1137_v30 = vsel %vm137_vm2, %v1133_v29, -inf  ;;  %v1822_v31 = vpop.f32.mrb[5].mxu1 }
 0x2d8   : > { %v1138_v32 = vsel %vm328_vm1, %v1137_v30, -inf }
 0x2d9   : > { %1139 = vmax.xlane.f32.xlu0 %v1138_v32 }
 0x2da   : > { %v1502_v33 = vpop.f32.mrb[6].mxu1 }
 0x2db   : > { %v1506_v34 = vsel %vm137_vm2, %v1502_v33, -inf  ;;  %v1832_v35 = vpop.f32.mrb[7].mxu1 }
 0x2dc   : > { %v1507_v36 = vsel %vm328_vm1, %v1506_v34, -inf }
 0x2dd   : > { %1508 = vmax.xlane.f32.xlu0 %v1507_v36 }
 0x2e6   : > { %1154 = vrot.lane.b32.xlu1 %v1984_v1, %s1937_s23 }
 0x2f3   : > { %1523 = vrot.lane.b32.xlu0 %v1984_v1, %s1938_s24 }
 0x362   : > { %v771_v37 = vpop.xlane.xlu1 %770 }
 0x363   : > { %v776_v38 = vsub.f32 %v768_v26, %v771_v37  ;;  %v773_v2 = vsub.f32 -inf, %v771_v37 }
 0x365   : > { %v777_v39 = vmul.f32 1.442695, %v776_v38  ;;  %v774_v3 = vmul.f32 1.442695, %v773_v2 }
 0x366   : > { %v1140_v40 = vpop.xlane.xlu0 %1139  ;;  %v1155_v46 = vpop.permute.xlu1 %1154 }
 0x367   : > { %v1145_v41 = vsub.f32 %v1137_v30, %v1140_v40  ;;  %1880 = vpow2.f32 %v777_v39  ;;  %v1142_v4 = vsub.f32 -inf, %v1140_v40 }
 0x369   : > { %v1146_v42 = vmul.f32 1.442695, %v1145_v41  ;;  %v1143_v5 = vmul.f32 1.442695, %v1142_v4 }
 0x36a   : > { %v1509_v43 = vpop.xlane.xlu0 %1508 }
 0x36b   : > { %v1514_v44 = vsub.f32 %v1506_v34, %v1509_v43  ;;  %1882 = vpow2.f32 %v1146_v42  ;;  %v1511_v6 = vsub.f32 -inf, %v1509_v43 }
 0x36d   : > { %v1515_v45 = vmul.f32 1.442695, %v1514_v44  ;;  %v1512_v7 = vmul.f32 1.442695, %v1511_v6 }
 0x36e   : > { %v1524_v49 = vpop.permute.xlu0 %1523 }
 0x36f   : > { %1884 = vpow2.f32 %v1515_v45 }
 0x370   : > { %1886 = vpow2.f32 %v410_v56 }
 0x371   : > { %v1881_v47 = vpop.eup %1880 }
 0x372   : > { %1816 = vmatmul.mubr.msk.f32.vlgmr.msra.gmra.mrb[2].mxu0 %vm328_vm1, %v1881_v47  ;;  %v780_v48 = vsel %vm328_vm1, %v1881_v47, 0.0 }
 0x373   : > { %1824 = vmatpush3.msra.mxu0 %v1155_v46  ;;  %781 = vadd.xlane.f32.xlu0 %v780_v48 }
 0x374   : > { %1825 = vmatprep.mubr.msk.f32.mxu0 %vm1927_vm0, %v1926_v0  ;;  %1833 = vmatprep.subr.mxu0 %v1926_v0 }
 0x375   : > { %v1883_v50 = vpop.eup %1882 }
 0x376   : > { %1826 = vmatmul.mubr.msk.f32.vlgmr.msra.gmra.mrb[4].mxu0 %vm328_vm1, %v1883_v50  ;;  %v1149_v51 = vsel %vm328_vm1, %v1883_v50, 0.0 }
 0x377   : > { %1834 = vmatpush3.msra.mxu0 %v1524_v49  ;;  %1150 = vadd.xlane.f32.xlu1 %v1149_v51 }
 0x378   : > { %1835 = vmatprep.mubr.msk.f32.mxu0 %vm1927_vm0, %v1926_v0 }
 0x379   : > { %v1885_v52 = vpop.eup %1884 }
 0x37a   : > { %1836 = vmatmul.mubr.msk.f32.vlgmr.msra.gmra.mrb[6].mxu0 %vm328_vm1, %v1885_v52  ;;  %v1518_v53 = vsel %vm328_vm1, %v1885_v52, 0.0  ;;  %v1887_v58 = vpop.eup %1886 }
 0x37b   : > { %1519 = vadd.xlane.f32.xlu0 %v1518_v53  ;;  %v415_v60 = vmul.f32 0.0, %v1887_v58 }
 0x37d   : > { %v497_v63 = vadd.f32 %v2023_v23, %v415_v60 }
 0x37f   : > { %417 = vadd.xlane.f32.xlu0 %v416_v54 }
 0x400   : > { %v782_v57 = vpop.xlane.xlu0 %781 }
 0x404   : > { %v1151_v12 = vpop.xlane.xlu1 %1150 }
 0x408   : > { %v1520_v59 = vpop.xlane.xlu0 %1519 }
 0x40c   : > { %v418_v61 = vpop.xlane.xlu0 %417 }
 0x40d   : > { %v419_v62 = vadd.f32 %v418_v61, %v415_v60 }
 0x40f   : > { %1888 = vrcp.f32 %v419_v62 }
 0x410   : > { %1890 = vpow2.f32 %v774_v3 }
 0x411   : > { %1892 = vpow2.f32 %v1143_v5 }
 0x412   : > { %1894 = vpow2.f32 %v1512_v7 }
 0x419   : > { %v1889_v0 = vpop.eup %1888 }
 0x41a   : > { %v499_v1 = vmul.f32 %v1889_v0, %v497_v63  ;;  %v1891_v8 = vpop.eup %1890 }
 0x41b   : > { %v779_v9 = vmul.f32 0.0, %v1891_v8  ;;  %v1893_v10 = vpop.eup %1892 }
 0x41c   : > { %500 = vst.msk [vmem:[%s2053_s27] sm:$0xff] %vm328_vm1, %v499_v1  ;;  %v1148_v13 = vmul.f32 0.0, %v1893_v10  ;;  %v1895_v14 = vpop.eup %1894 }
 0x41d   : > { %v783_v11 = vadd.f32 %v782_v57, %v779_v9  ;;  %v1517_v16 = vmul.f32 0.0, %v1895_v14 }
 0x41e   : > { %v1152_v15 = vadd.f32 %v1151_v12, %v1148_v13 }
 0x41f   : > { %1896 = vrcp.f32 %v783_v11  ;;  %v1521_v17 = vadd.f32 %v1520_v59, %v1517_v16 }
 0x420   : > { %1898 = vrcp.f32 %v1152_v15 }
 0x421   : > { %1900 = vrcp.f32 %v1521_v17 }
 0x429   : > { %v1897_v21 = vpop.eup %1896 }
 0x42a   : > { %v1899_v26 = vpop.eup %1898 }
 0x42b   : > { %v1901_v31 = vpop.eup %1900 }
 0x445   : > { %v857_v18 = vpop.f32.mrb[2].mxu0 }
 0x446   : > { %v861_v19 = vadd.f32 %v857_v18, %v779_v9  ;;  %v1817_v20 = vpop.f32.mrb[3].mxu0 }
 0x448   : > { %v863_v22 = vmul.f32 %v1897_v21, %v861_v19 }
 0x449   : > { %v1226_v23 = vpop.f32.mrb[4].mxu0 }
 0x44a   : > { %v1230_v24 = vadd.f32 %v1226_v23, %v1148_v13  ;;  %865 = vrot.lane.b32.xlu0 %v863_v22, %s1939_s28  ;;  %v1827_v25 = vpop.f32.mrb[5].mxu0 }
 0x44c   : > { %v1232_v27 = vmul.f32 %v1899_v26, %v1230_v24 }
 0x44d   : > { %v1595_v28 = vpop.f32.mrb[6].mxu0 }
 0x44e   : > { %v1599_v29 = vadd.f32 %v1595_v28, %v1517_v16  ;;  %1234 = vrot.lane.b32.xlu1 %v1232_v27, %s1940_s29  ;;  %v1837_v30 = vpop.f32.mrb[7].mxu0 }
 0x450   : > { %v1601_v32 = vmul.f32 %v1901_v31, %v1599_v29 }
 0x452   : > { %1603 = vrot.lane.b32.xlu0 %v1601_v32, %s1941_s30 }
 0x4bc   : > { %v866_v33 = vpop.permute.xlu0 %865 }
 0x4bd   : > { %869 = vst.msk [vmem:[%s2053_s27] sm:$0xff] %vm868_vm3, %v866_v33 }
 0x4c0   : > { %v1235_v34 = vpop.permute.xlu1 %1234 }
 0x4c1   : > { %1238 = vst.msk [vmem:[%s2053_s27] sm:$0xff] %vm1237_vm4, %v1235_v34 }
 0x4c4   : > { %v1604_v35 = vpop.permute.xlu0 %1603 }
 0x4c5   : > { %1607 = vst.msk [vmem:[%s2053_s27] sm:$0xff] %vm1606_vm5, %v1604_v35 }
 0x4c6 PF: > { %s11_s8 = sadd.s32 1, %s1924_s8   ;;  %s2071_s6 = smov %s1920_s7 }
 0x4c7   : > { %p8_p5 = scmp.ge.s32.totalorder %s11_s8, 4   ;;  %s2072_s7 = smov %s2074_s9 }
 0x4c9   :  { %10 = sbr.rel (!%p8_p5) target bundleno = 2 (0x2), region = 131 }

</bundles_post_ra>
